<compile_context>
chip_gen: v5e
topology: v5e:2x2
jax: 0.10.0
libtpu: 0.0.40
codegen_flags: <defaults>
</compile_context>

<pallas_src>
import jax
import jax.numpy as jnp
from jax.experimental import pallas as pl
from jax.experimental.pallas import tpu as pltpu


# ----------------------------- kernels ------------------------------------


def _mlp_kernel_single(x_ref, w1_ref, b1_ref, w2_ref, b2_ref, o_ref):
    """Whole problem resident in VMEM (no grid, no pipeline scaffolding)."""
    # linear1: x @ W1^T.  Weights were pre-transposed in the wrapper, so the
    # contraction is on RHS dim 0 -> straight MXU feed, no in-kernel re-layout.
    h = jnp.dot(x_ref[...], w1_ref[...], preferred_element_type=jnp.float32)
    h = jnp.maximum(h + b1_ref[...], 0.0)          # bias + ReLU on f32 VPU path
    # linear2: ReLU output cast back to the MXU compute dtype, f32 accumulate.
    y = jnp.dot(h.astype(w2_ref.dtype), w2_ref[...],
                preferred_element_type=jnp.float32)
    o_ref[...] = (y + b2_ref[...]).astype(o_ref.dtype)


def _mlp_kernel_blocked(x_ref, w1_ref, b1_ref, w2_ref, b2_ref, o_ref, acc_ref):
    """Batch-tiled (grid axis 0, 'parallel') and hidden-blocked (grid axis 1,
    'arbitrary' reduction) path with a f32 VMEM accumulator."""
    j = pl.program_id(1)

    @pl.when(j == 0)
    def _():
        acc_ref[...] = jnp.zeros_like(acc_ref)

    # layer 1 for this hidden block: [tile_n, tile_h]
    h = jnp.dot(x_ref[...], w1_ref[...], preferred_element_type=jnp.float32)
    h = jnp.maximum(h + b1_ref[...], 0.0)
    # layer 2 partial product accumulated over hidden blocks.
    acc_ref[...] += jnp.dot(h.astype(w2_ref.dtype), w2_ref[...],
                            preferred_element_type=jnp.float32)

    @pl.when(j == pl.num_programs(1) - 1)
    def _():
        o_ref[...] = (acc_ref[...] + b2_ref[...]).astype(o_ref.dtype)


# ----------------------------- wrapper -------------------------------------


def _cdiv(a, b):
    return -(-a // b)


def _round_up(x, m):
    return ((x + m - 1) // m) * m


def _pad2d(a, rows, cols):
    pr, pc = rows - a.shape[0], cols - a.shape[1]
    if pr == 0 and pc == 0:
        return a
    return jnp.pad(a, ((0, pr), (0, pc)))


def _vmem_budget_bytes():
    """~75% of physical VMEM per core (v5e/v6e 128 MiB -> ~96 MiB, v7x 64 MiB
    -> ~48 MiB), leaving headroom for pipeline buffers + Mosaic scratch."""
    fallback = 64 * 1024 * 1024
    try:
        cap = int(getattr(pltpu.get_tpu_info(), "vmem_capacity_bytes", fallback))
    except Exception:  # pragma: no cover - conservative fallback
        cap = fallback
    return (cap * 3) // 4


def two_layer_net(x, w1, b1, w2, b2, *, compute_dtype=jnp.bfloat16,
                  tile_n=512, tile_h=512, lane=128, use_grid=None):
    """Forward of TwoLayerNet: relu(x @ W1^T + b1) @ W2^T + b2.

    x: [N, D_in]; w1: [H, D_in], b1: [H]; w2: [D_out, H], b2: [D_out]
    (PyTorch nn.Linear layout).  MXU inputs are cast to `compute_dtype`
    (bf16 by default); accumulation / bias / ReLU are f32.
    """
    N, D_in = x.shape
    H = w1.shape[0]
    D_out = w2.shape[0]
    out_dtype = x.dtype

    cdt = jnp.dtype(compute_dtype)
    sub = 8 if cdt.itemsize >= 4 else 16        # sublane packing of compute dtype
    # TODO(synk): consider 256-lane alignment of H/D_out on v6e/v7x (256x256 MXU).

    D_in_p = _round_up(D_in, lane)
    H_p = _round_up(H, lane)
    D_out_p = _round_up(D_out, lane)
    N_sub = _round_up(N, sub)

    vmem_budget = _vmem_budget_bytes()

    # One-time wrapper-side transpose (single HBM pass of the weights) so the
    # kernel contracts on RHS dim 0 every step instead of re-laying out the
    # weight tile for the MXU each grid iteration.
    w1t = w1.T.astype(compute_dtype)            # [D_in, H]
    w2t = w2.T.astype(compute_dtype)            # [H, D_out]
    xc = x.astype(compute_dtype)
    b1f = b1.astype(jnp.float32).reshape(1, H)
    b2f = b2.astype(jnp.float32).reshape(1, D_out)

    if use_grid is None:
        # Path choice by resident-VMEM-bytes estimate, not by N alone.
        single_bytes = (
            (N_sub * D_in_p + D_in_p * H_p + H_p * D_out_p) * cdt.itemsize
            + (H_p + D_out_p) * 4                              # f32 biases
            + N_sub * H_p * 4                                  # f32 hidden
            + N_sub * D_out_p * jnp.dtype(out_dtype).itemsize  # output
        )
        use_grid = single_bytes > vmem_budget // 2

    if not use_grid:
        # Small problem: single shot, everything resident in VMEM.
        xp = _pad2d(xc, N_sub, D_in_p)
        w1p = _pad2d(w1t, D_in_p, H_p)
        w2p = _pad2d(w2t, H_p, D_out_p)
        b1p = _pad2d(b1f, 1, H_p)
        b2p = _pad2d(b2f, 1, D_out_p)
        yp = pl.pallas_call(
            _mlp_kernel_single,
            out_shape=jax.ShapeDtypeStruct((N_sub, D_out_p), out_dtype),
            in_specs=[pl.BlockSpec(memory_space=pltpu.MemorySpace.VMEM)] * 5,
            out_specs=pl.BlockSpec(memory_space=pltpu.MemorySpace.VMEM),
            compiler_params=pltpu.CompilerParams(vmem_limit_bytes=vmem_budget),
        )(xp, w1p, b1p, w2p, b2p)
        return yp[:N, :D_out]

    # ---- Batch-tiled + hidden-blocked grid path ---------------------------
    n_bt = _cdiv(N_sub, tile_n)
    if n_bt > 1:
        n_bt += n_bt % 2            # even step count -> balanced on v7x's 2 TCs
    tile_n_eff = _round_up(_cdiv(N_sub, n_bt), sub)
    N_p = n_bt * tile_n_eff         # overshoot bounded by sublane rounding only

    n_ht = _cdiv(H_p, tile_h)
    tile_h_eff = _round_up(_cdiv(H_p, n_ht), lane)
    H_pp = n_ht * tile_h_eff

    xp = _pad2d(xc, N_p, D_in_p)
    w1p = _pad2d(w1t, D_in_p, H_pp)
    w2p = _pad2d(w2t, H_pp, D_out_p)
    b1p = _pad2d(b1f, 1, H_pp)
    b2p = _pad2d(b2f, 1, D_out_p)

    yp = pl.pallas_call(
        _mlp_kernel_blocked,
        out_shape=jax.ShapeDtypeStruct((N_p, D_out_p), out_dtype),
        grid=(n_bt, n_ht),
        in_specs=[
            # x tile: stationary across the (inner) hidden axis.
            pl.BlockSpec((tile_n_eff, D_in_p), lambda i, j: (i, 0)),
            # Streamed weight / bias blocks (change with j -> keep default
            # double-buffering so the next hidden block prefetches).
            pl.BlockSpec((D_in_p, tile_h_eff), lambda i, j: (0, j)),
            pl.BlockSpec((1, tile_h_eff), lambda i, j: (0, j)),
            pl.BlockSpec((tile_h_eff, D_out_p), lambda i, j: (j, 0)),
            # b2 is fully stationary; a single padded f32 row, so its default
            # 2x buffering is negligible VMEM.
            pl.BlockSpec((1, D_out_p), lambda i, j: (0, 0)),
        ],
        out_specs=pl.BlockSpec((tile_n_eff, D_out_p), lambda i, j: (i, 0)),
        scratch_shapes=[pltpu.VMEM((tile_n_eff, D_out_p), jnp.float32)],
        compiler_params=pltpu.CompilerParams(
            dimension_semantics=("parallel", "arbitrary"),
            vmem_limit_bytes=vmem_budget,
        ),
    )(xp, w1p, b1p, w2p, b2p)
    return yp[:N, :D_out]


# ----------------------------- demo / check --------------------------------

if __name__ == "__main__":
    key = jax.random.PRNGKey(0)
    k = jax.random.split(key, 10)

    # Test 1: tiny module shapes, f32 MXU inputs -> exact check (no-grid path).
    N, D_in, H, D_out = 8, 16, 32, 8
    x = jax.random.normal(k[0], (N, D_in), dtype=jnp.float32)
    w1 = jax.random.normal(k[1], (H, D_in), dtype=jnp.float32) * 0.1
    b1 = jax.random.normal(k[2], (H,), dtype=jnp.float32) * 0.1
    w2 = jax.random.normal(k[3], (D_out, H), dtype=jnp.float32) * 0.1
    b2 = jax.random.normal(k[4], (D_out,), dtype=jnp.float32) * 0.1

    y = jax.block_until_ready(
        two_layer_net(x, w1, b1, w2, b2, compute_dtype=jnp.float32))
    y_ref = jnp.maximum(x @ w1.T + b1, 0.0) @ w2.T + b2
    assert y.shape == (N, D_out)
    assert jnp.allclose(y, y_ref, atol=1e-5, rtol=1e-5)

    # Test 2: exercise the batch-tiled + hidden-blocked grid path with bf16
    # MXU inputs (looser tolerance is precision-, not correctness-limited).
    N2, D_in2, H2, D_out2 = 300, 200, 700, 120
    x2 = jax.random.normal(k[5], (N2, D_in2), dtype=jnp.float32)
    w1b = jax.random.normal(k[6], (H2, D_in2), dtype=jnp.float32) * 0.05
    b1b = jax.random.normal(k[7], (H2,), dtype=jnp.float32) * 0.05
    w2b = jax.random.normal(k[8], (D_out2, H2), dtype=jnp.float32) * 0.05
    b2b = jax.random.normal(k[9], (D_out2,), dtype=jnp.float32) * 0.05

    y2 = jax.block_until_ready(two_layer_net(
        x2, w1b, b1b, w2b, b2b,
        compute_dtype=jnp.bfloat16, tile_n=128, tile_h=256, use_grid=True))
    y2_ref = jnp.maximum(x2 @ w1b.T + b1b, 0.0) @ w2b.T + b2b
    assert y2.shape == (N2, D_out2)
    assert jnp.allclose(y2, y2_ref, atol=1e-1, rtol=1e-1)

    print("KERNEL_OK")
</pallas_src>

<mosaic_0001>
module attributes {stable_mosaic.version = 11 : i64} {
  func.func @_mlp_kernel_single(%arg0: memref<8x128xf32, #tpu.memory_space<vmem>>, %arg1: memref<128x128xf32, #tpu.memory_space<vmem>>, %arg2: memref<1x128xf32, #tpu.memory_space<vmem>>, %arg3: memref<128x128xf32, #tpu.memory_space<vmem>>, %arg4: memref<1x128xf32, #tpu.memory_space<vmem>>, %arg5: memref<8x128xf32, #tpu.memory_space<vmem>>) attributes {dimension_semantics = [], scalar_prefetch = 0 : i64, scratch_operands = 0 : i64, tpu.core_type = #tpu.core_type<tc>} {
    %c0 = arith.constant 0 : index
    %c0_0 = arith.constant 0 : index
    %0 = vector.load %arg0[%c0, %c0_0] : memref<8x128xf32, #tpu.memory_space<vmem>>, vector<8x128xf32>
    %c0_1 = arith.constant 0 : index
    %c0_2 = arith.constant 0 : index
    %1 = vector.load %arg1[%c0_1, %c0_2] : memref<128x128xf32, #tpu.memory_space<vmem>>, vector<128x128xf32>
    %cst = arith.constant dense<0.000000e+00> : vector<8x128xf32>
    %2 = tpu.matmul %0, %1, %cst {dimension_numbers = #tpu.dot_dimension_numbers<[1], [0], [0], [1], [0, 0, 1, 1], [], []>} : vector<8x128xf32>, vector<128x128xf32>, vector<8x128xf32> -> vector<8x128xf32>
    %c0_3 = arith.constant 0 : index
    %c0_4 = arith.constant 0 : index
    %3 = vector.load %arg2[%c0_3, %c0_4] : memref<1x128xf32, #tpu.memory_space<vmem>>, vector<1x128xf32>
    %4 = vector.broadcast %3 : vector<1x128xf32> to vector<8x128xf32>
    %5 = arith.addf %2, %4 : vector<8x128xf32>
    %cst_5 = arith.constant 0.000000e+00 : f32
    %6 = vector.broadcast %cst_5 : f32 to vector<8x128xf32>
    %7 = arith.maximumf %5, %6 : vector<8x128xf32>
    %c0_6 = arith.constant 0 : index
    %c0_7 = arith.constant 0 : index
    %8 = vector.load %arg3[%c0_6, %c0_7] : memref<128x128xf32, #tpu.memory_space<vmem>>, vector<128x128xf32>
    %cst_8 = arith.constant dense<0.000000e+00> : vector<8x128xf32>
    %9 = tpu.matmul %7, %8, %cst_8 {dimension_numbers = #tpu.dot_dimension_numbers<[1], [0], [0], [1], [0, 0, 1, 1], [], []>} : vector<8x128xf32>, vector<128x128xf32>, vector<8x128xf32> -> vector<8x128xf32>
    %c0_9 = arith.constant 0 : index
    %c0_10 = arith.constant 0 : index
    %10 = vector.load %arg4[%c0_9, %c0_10] : memref<1x128xf32, #tpu.memory_space<vmem>>, vector<1x128xf32>
    %11 = vector.broadcast %10 : vector<1x128xf32> to vector<8x128xf32>
    %12 = arith.addf %9, %11 : vector<8x128xf32>
    %c0_11 = arith.constant 0 : index
    %c0_12 = arith.constant 0 : index
    %13 = vector.load %arg5[%c0_11, %c0_12] : memref<8x128xf32, #tpu.memory_space<vmem>>, vector<8x128xf32>
    tpu.vector_store %arg5[%c0_11, %c0_12], %12 {strides = array<i32>} : memref<8x128xf32, #tpu.memory_space<vmem>>, vector<8x128xf32>,
    return
  }
}

</mosaic_0001>

<bundles_post_ra>
// kernel: tpu_custom_call.1
= control target key start
LH: loop header
LB: loop body
LE: loop exit
PB: predicated region body
PF: predicated region fallthrough
CT: control target
= control target key end

     0   :  { %10 = vsyncpa [#allocation3], 0  ;;  %s331_s0 = inlined_call_operand.hbm [shape: f32[8,128], index: 0, kind: input, shape index: {}]   ;;  %s332_s1 = inlined_call_operand.hbm [shape: f32[128,128], index: 1, kind: input, shape index: {}]   ;;  %s333_s2 = inlined_call_operand.vmem [shape: f32[1,128], index: 2, kind: input, shape index: {}]   ;;  %s334_s3 = inlined_call_operand.hbm [shape: f32[128,128], index: 3, kind: input, shape index: {}]   ;;  %s335_s4 = inlined_call_operand.vmem [shape: f32[1,128], index: 4, kind: input, shape index: {}]   ;;  %s336_s5 = inlined_call_operand.hbm [shape: f32[8,128], index: 5, kind: output, shape index: {}]  }
   0x1   :  { %11 = vsyncpa [#allocation6], 0  ;;  %s28_s20 = sshll.u32 %s332_s1, 4  ;;  %s29_s20 = int_to_ptr.hbm [resolvable:$true] %s28_s20 }
   0x2   :  { %12 = vsyncpa [#allocation4], 0  ;;  %s277_s21 = smov [#allocation5]   ;;  %s18_s25 = sshll.u32 %s331_s0, 4  ;;  %s19_s25 = int_to_ptr.hbm [resolvable:$true] %s18_s25 }
   0x3   :  { %s30_s22 = sshll.u32 %s277_s21, 4  ;;  %s278_s26 = smov 128   ;;  %s31_s22 = int_to_ptr.vmem [resolvable:$true] %s30_s22 }
   0x4   :  { %s279_s27 = smov 8   ;;  %s280_s28 = smov [#allocation2]  }
   0x5   :  { %36 = dma.hbm_to_vmem [thread:$0]  %s29_s20, 2048, %s31_s22, [#allocation6], %s278_s26, %s278_s26, %s279_s27  }
   0x6   :  { %s20_s29 = sshll.u32 %s280_s28, 4  ;;  %s43_s7 = sshll.u32 %s334_s3, 4  ;;  %s21_s29 = int_to_ptr.vmem [resolvable:$true] %s20_s29  ;;  %s44_s7 = int_to_ptr.hbm [resolvable:$true] %s43_s7 }
   0x7   :  { %23 = dma.hbm_to_vmem [thread:$0]  %s19_s25, 128, %s21_s29, [#allocation3]  }
   0x8   :  { %s281_s1 = smov [#allocation7]  }
   0x9   :  { %s45_s8 = sshll.u32 %s281_s1, 4  ;;  %s46_s8 = int_to_ptr.vmem [resolvable:$true] %s45_s8 }
   0xa   :  { %51 = dma.hbm_to_vmem [thread:$0]  %s44_s7, 2048, %s46_s8, [#allocation6], %s278_s26, %s278_s26, %s279_s27  }
   0xb   :  { %271 = dma.done.wait [#allocation3], 128  }
   0xc   :  { %272 = vsyncadd [#allocation3], 4294967168 }
   0xd   :  { %273 = dma.done.wait [#allocation6], 4096  }
   0xe   :  { %274 = vsyncadd [#allocation6], 4294963200  ;;  %v82_v0 = vld [vmem:[#allocation5 + $0x78] sm:$0xff]  ;;  %v81_v1 = vld [vmem:[#allocation5 + $0x70] sm:$0xff]  ;;  %s282_s11 = smov [#allocation8]   ;;  %s156_s15 = sshll.u32 %s336_s5, 4  ;;  %s157_s15 = int_to_ptr.hbm [resolvable:$true] %s156_s15 }
   0xf   :  { %87 = vmatpush.msra.mxu0 %v82_v0  ;;  %v80_v2 = vld [vmem:[#allocation5 + $0x68] sm:$0xff]  ;;  %v79_v3 = vld [vmem:[#allocation5 + $0x60] sm:$0xff]  ;;  %v123_v4 = vld [vmem:[#allocation7 + $0x78] sm:$0xff]  ;;  %s154_s12 = sshll.u32 %s282_s11, 4  ;;  %s155_s12 = int_to_ptr.vmem [resolvable:$true] %s154_s12 }
  0x10   :  { %v78_v5 = vld [vmem:[#allocation5 + $0x58] sm:$0xff]  ;;  %128 = vmatpush.msra.mxu1 %v123_v4  ;;  %v122_v6 = vld [vmem:[#allocation7 + $0x70] sm:$0xff]  ;;  %v121_v7 = vld [vmem:[#allocation7 + $0x68] sm:$0xff] }
  0x11   :  { %88 = vmatpush.msra.mxu0 %v81_v1  ;;  %v77_v8 = vld [vmem:[#allocation5 + $0x50] sm:$0xff]  ;;  %v120_v9 = vld [vmem:[#allocation7 + $0x60] sm:$0xff]  ;;  %v76_v10 = vld [vmem:[#allocation5 + $0x48] sm:$0xff] }
  0x12   :  { %129 = vmatpush.msra.mxu1 %v122_v6  ;;  %v119_v11 = vld [vmem:[#allocation7 + $0x58] sm:$0xff]  ;;  %v75_v12 = vld [vmem:[#allocation5 + $0x40] sm:$0xff]  ;;  %v118_v13 = vld [vmem:[#allocation7 + $0x50] sm:$0xff] }
  0x13   :  { %89 = vmatpush.msra.mxu0 %v80_v2  ;;  %v74_v14 = vld [vmem:[#allocation5 + $0x38] sm:$0xff]  ;;  %v117_v15 = vld [vmem:[#allocation7 + $0x48] sm:$0xff]  ;;  %v73_v16 = vld [vmem:[#allocation5 + $0x30] sm:$0xff] }
  0x14   :  { %130 = vmatpush.msra.mxu1 %v121_v7  ;;  %v116_v17 = vld [vmem:[#allocation7 + $0x40] sm:$0xff]  ;;  %v72_v18 = vld [vmem:[#allocation5 + $0x28] sm:$0xff]  ;;  %v115_v19 = vld [vmem:[#allocation7 + $0x38] sm:$0xff] }
  0x15   :  { %90 = vmatpush.msra.mxu0 %v79_v3  ;;  %v71_v20 = vld [vmem:[#allocation5 + $0x20] sm:$0xff]  ;;  %v114_v21 = vld [vmem:[#allocation7 + $0x30] sm:$0xff]  ;;  %v70_v22 = vld [vmem:[#allocation5 + $0x18] sm:$0xff] }
  0x16   :  { %131 = vmatpush.msra.mxu1 %v120_v9  ;;  %v113_v23 = vld [vmem:[#allocation7 + $0x28] sm:$0xff]  ;;  %v69_v24 = vld [vmem:[#allocation5 + $0x10] sm:$0xff]  ;;  %v112_v25 = vld [vmem:[#allocation7 + $0x20] sm:$0xff] }
  0x17   :  { %91 = vmatpush.msra.mxu0 %v78_v5  ;;  %v68_v26 = vld [vmem:[#allocation5 + $0x8] sm:$0xff]  ;;  %v111_v27 = vld [vmem:[#allocation7 + $0x18] sm:$0xff]  ;;  %v67_v28 = vld [vmem:[#allocation5] sm:$0xff] }
  0x18   :  { %132 = vmatpush.msra.mxu1 %v119_v11  ;;  %v66_v29 = vld [vmem:[#allocation2] sm:$0xff]  ;;  %v110_v30 = vld [vmem:[#allocation7 + $0x10] sm:$0xff]  ;;  %v109_v31 = vld [vmem:[#allocation7 + $0x8] sm:$0xff] }
  0x19   :  { %92 = vmatpush.msra.mxu0 %v77_v8  ;;  %v108_v32 = vld [vmem:[#allocation7] sm:$0xff]  ;;  %v173_v33 = vld [vmem:[%s333_s2] ss:$0 sm:$0xff] }
  0x1a   :  { %133 = vmatpush.msra.mxu1 %v118_v13  ;;  %v174_v37 = vld [vmem:[%s335_s4] ss:$0 sm:$0xff] }
  0x1b   :  { %93 = vmatpush.msra.mxu0 %v76_v10 }
  0x1c   :  { %134 = vmatpush.msra.mxu1 %v117_v15 }
  0x1d   :  { %94 = vmatpush.msra.mxu0 %v75_v12 }
  0x1e   :  { %135 = vmatpush.msra.mxu1 %v116_v17 }
  0x1f   :  { %95 = vmatpush.msra.mxu0 %v74_v14 }
  0x20   :  { %136 = vmatpush.msra.mxu1 %v115_v19 }
  0x21   :  { %96 = vmatpush.msra.mxu0 %v73_v16 }
  0x22   :  { %137 = vmatpush.msra.mxu1 %v114_v21 }
  0x23   :  { %97 = vmatpush.msra.mxu0 %v72_v18 }
  0x24   :  { %138 = vmatpush.msra.mxu1 %v113_v23 }
  0x25   :  { %98 = vmatpush.msra.mxu0 %v71_v20 }
  0x26   :  { %139 = vmatpush.msra.mxu1 %v112_v25 }
  0x27   :  { %99 = vmatpush.msra.mxu0 %v70_v22 }
  0x28   :  { %140 = vmatpush.msra.mxu1 %v111_v27 }
  0x29   :  { %100 = vmatpush.msra.mxu0 %v69_v24 }
  0x2a   :  { %141 = vmatpush.msra.mxu1 %v110_v30 }
  0x2b   :  { %101 = vmatpush.msra.mxu0 %v68_v26 }
  0x2c   :  { %142 = vmatpush.msra.mxu1 %v109_v31 }
  0x2d   :  { %102 = vmatpush.msra.mxu0 %v67_v28 }
  0x2e   :  { %103 = vmatmul.f32.vlgmr.msra.gmra.mxu0 %v66_v29  ;;  %143 = vmatpush.msra.mxu1 %v108_v32 }
  0xab   :  { %v104_v34 = vpop.f32.mrf.mxu0 }
  0xac   :  { %v105_v35 = vadd.f32 %v173_v33, %v104_v34 }
  0xae   :  { %v107_v36 = vmax.f32 %v105_v35, 0.0 }
  0xb0   :  { %144 = vmatmul.f32.vlgmr.msra.gmra.mxu1 %v107_v36 }
 0x12d   :  { %v145_v38 = vpop.f32.mrf.mxu1 }
 0x12e   :  { %v146_v39 = vadd.f32 %v174_v37, %v145_v38 }
 0x130   :  { %148 = vst [vmem:[#allocation8] sm:$0xff] %v146_v39 }
 0x131   :  { %159 = dma.vmem_to_hbm [thread:$0]  %s155_s12, 128, %s157_s15, [#allocation4]  }
 0x132   :  { %275 = dma.done.wait [#allocation4], 128  }
 0x133   :  { %276 = vsyncadd [#allocation4], 4294967168 }
 0x134   :  { %164 = vsyncpa [#allocation3], 1 }
 0x135   :  { %165 = vsyncpa [#allocation6], 1 }
 0x136   :  { %166 = vsyncpa [#allocation4], 1 }

</bundles_post_ra>
